<compile_context>
chip_gen: v6e
topology: v6e:2x2x1
jax: 0.10.0
libtpu: 0.0.40
codegen_flags: <defaults>
</compile_context>

<pallas_src>
import functools

import jax
import jax.numpy as jnp
from jax.experimental import pallas as pl
from jax.experimental.pallas import tpu as pltpu


def _mpnn_fused_kernel(h0_ref, am_ref, mask_ref, we_ref, wg_ref, bg_ref,
                       wr_ref, br_ref, out_ref, *,
                       n_layers, n_nodes, e_aug, hidden, target,
                       mode, log_softmax):
    """n_layers x (EdgeNetwork message + GRU update) + GGNN readout for one
    block of Bb graphs.  All dense matmuls are stacked over the Bb*N node rows;
    only the neighbour aggregation (which needs the per-graph adjacency) is a
    batched per-graph contraction."""
    Bb = h0_ref.shape[0]
    N, H, T = n_nodes, hidden, target
    R = Bb * N
    cdt = we_ref.dtype                        # MXU compute dtype (bf16 by default)

    h0 = h0_ref[...].reshape(R, H)            # (R, H)  f32  padded input / layer-0 state
    mask = mask_ref[...].reshape(R, 1)        # (R, 1)  f32  node validity
    am = am_ref[...]                          # (Bb, e_aug*N, N) cdt, rows k*N + v,
                                              #   last N-row block = all-ones pseudo label
    we = we_ref[...]                          # (e_aug*H, M) cdt   [We_1;..;We_E; be]
    wg = wg_ref[...]                          # (M+H, 4H)    cdt   fused GRU weights
    bg = bg_ref[...]                          # (1, 4H)      f32   fused GRU biases

    def layer(_, h):                          # h: (R, H) f32
        h3 = h.reshape(Bb, N, H).astype(cdt)
        # Per-graph neighbour aggregation (incl. the bias pseudo-label); the
        # batched einsum loops over the Bb graphs inside this step.
        p = jnp.einsum('bpw,bwh->bph', am, h3,
                       preferred_element_type=jnp.float32)          # (Bb, e_aug*N, H)
        # Restack label blocks along lanes -> (Bb, N, e_aug*H) using only
        # contiguous row slices + lane concat (no VMEM scratch round-trip).
        p = jnp.concatenate(
            [p[:, k * N:(k + 1) * N, :] for k in range(e_aug)], axis=2)
        # One deep MXU push for all Bb*N nodes: K = e_aug*H (=128 at E=3,H=32);
        # the last H rows of `we` carry the EdgeNetwork bias-message term.
        msg = jnp.dot(p.reshape(R, e_aug * H).astype(cdt), we,
                      preferred_element_type=jnp.float32)            # (R, M)

        # GGNN update: single-step GRU, one fused gate matmul (K = M + H),
        # lane-dense gate slab [r | z | n_input | n_hidden].
        gates = jnp.dot(jnp.concatenate([msg, h], axis=1).astype(cdt), wg,
                        preferred_element_type=jnp.float32) + bg      # (R, 4H)
        rz = jax.nn.sigmoid(gates[:, :2 * H])
        r = rz[:, :H]
        z = rz[:, H:]
        n = jnp.tanh(gates[:, 2 * H:3 * H] + r * gates[:, 3 * H:4 * H])
        # node_mask * h_t, as in the reference (mask applied at the end of each
        # layer; layer-0 h is the caller-provided padded input, unmasked).
        return mask * ((1.0 - z) * n + z * h)

    h = jax.lax.fori_loop(0, n_layers, layer, h0)                     # (R, H) f32

    if mode == 'embedding':
        # GGNN gated readout: sum_v mask_v * sigmoid(i([h_v, x_v])) * j(h_v),
        # fused into a single matmul against [h | h0].
        gv = jnp.dot(jnp.concatenate([h, h0], axis=1).astype(cdt), wr_ref[...],
                     preferred_element_type=jnp.float32) + br_ref[...]   # (R, 2T)
        gate = jax.nn.sigmoid(gv[:, :T])
        val = gv[:, T:]
        contrib = (gate * val) * mask                                     # (R, T)
        res = jnp.sum(contrib.reshape(Bb, N, T), axis=1, keepdims=True)   # (Bb, 1, T)
        if log_softmax:                        # classification head
            mx = jnp.max(res, axis=-1, keepdims=True)
            res = res - (mx + jnp.log(jnp.sum(jnp.exp(res - mx),
                                              axis=-1, keepdims=True)))
        out_ref[...] = res
    else:
        out_ref[...] = h.reshape(Bb, N, H)


class MpnnGGNN:
    """JAX/Pallas re-implementation of models/MpnnGGNN.py (discrete_edge=False)."""

    def __init__(self, in_size, e_size, hidden_state_size, message_size,
                 n_layers, target_size, key, out_type='classification',
                 matmul_dtype=jnp.bfloat16):
        self.in_size = in_size
        self.e_size = e_size
        self.hidden = hidden_state_size
        self.msg = message_size
        self.n_layers = n_layers
        self.target = target_size
        self.out_type = out_type.lower()
        self.mm_dtype = matmul_dtype
        self._call_cache = {}

        H, M, E, F, T = hidden_state_size, message_size, e_size, in_size, target_size
        assert F <= H, "in_size must not exceed hidden_state_size"
        ks = jax.random.split(key, 10)
        s = 0.1

        # ---- Message function: EdgeNetwork -> Linear(E, M*H) ----------------
        w_edge = s * jax.random.normal(ks[0], (M * H, E), jnp.float32)
        b_edge = s * jax.random.normal(ks[1], (M * H,), jnp.float32)
        we3 = w_edge.reshape(M, H, E)                                  # [m, h, k]
        we_stack = jnp.transpose(we3, (2, 1, 0)).reshape(E * H, M)     # rows k*H + h
        be_mat = jnp.transpose(b_edge.reshape(M, H))                   # (H, M)
        # Augmented edge weights: the extra H rows (paired with the all-ones
        # pseudo edge label in am_aug) realise the bias message sum_w be^T h_w.
        self.we_aug = jnp.concatenate([we_stack, be_mat], axis=0).astype(matmul_dtype)

        # ---- Update function: nn.GRU(M -> H), single step, weight tying -----
        w_ih = s * jax.random.normal(ks[2], (3 * H, M), jnp.float32)
        w_hh = s * jax.random.normal(ks[3], (3 * H, H), jnp.float32)
        b_ih = s * jax.random.normal(ks[4], (3 * H,), jnp.float32)
        b_hh = s * jax.random.normal(ks[5], (3 * H,), jnp.float32)
        wih_t, whh_t = w_ih.T, w_hh.T                                  # (M,3H), (H,3H)
        # lane-dense (., 4H) packing: [r | z | n_input | n_hidden]
        wg_m = jnp.concatenate(
            [wih_t[:, :2 * H], wih_t[:, 2 * H:], jnp.zeros((M, H), jnp.float32)],
            axis=1)                                                    # (M, 4H)
        wg_h = jnp.concatenate(
            [whh_t[:, :2 * H], jnp.zeros((H, H), jnp.float32), whh_t[:, 2 * H:]],
            axis=1)                                                    # (H, 4H)
        self.wg = jnp.concatenate([wg_m, wg_h], axis=0).astype(matmul_dtype)  # (M+H, 4H)
        self.b_gru = jnp.concatenate(
            [b_ih[:2 * H] + b_hh[:2 * H], b_ih[2 * H:], b_hh[2 * H:]]
        ).reshape(1, 4 * H)                                            # f32

        # ---- Readout: i: Linear(H + F, T), j: Linear(H, T), fused ------------
        w_i = s * jax.random.normal(ks[6], (T, H + F), jnp.float32)
        b_i = s * jax.random.normal(ks[7], (T,), jnp.float32)
        w_j = s * jax.random.normal(ks[8], (T, H), jnp.float32)
        b_j = s * jax.random.normal(ks[9], (T,), jnp.float32)
        wi_h = w_i[:, :H].T                                            # (H, T)
        wi_x = w_i[:, H:].T                                            # (F, T)
        if H > F:   # zero-pad so the padded h0 can be used directly for the x part
            wi_x = jnp.concatenate([wi_x, jnp.zeros((H - F, T), jnp.float32)], axis=0)
        top = jnp.concatenate([wi_h, w_j.T], axis=1)                   # (H, 2T)
        bot = jnp.concatenate([wi_x, jnp.zeros((H, T), jnp.float32)], axis=1)
        self.w_read = jnp.concatenate([top, bot], axis=0).astype(matmul_dtype)  # (2H, 2T)
        self.b_read = jnp.concatenate([b_i, b_j]).reshape(1, 2 * T)    # f32

        # raw parameters kept for the pure-JAX reference check
        self._raw = dict(w_edge=w_edge, b_edge=b_edge, w_ih=w_ih, w_hh=w_hh,
                         b_ih=b_ih, b_hh=b_hh, w_i=w_i, b_i=b_i, w_j=w_j, b_j=b_j)

    # ---- fused pallas_call builder -----------------------------------------
    def _build_call(self, b_pad, bb, n_nodes, mode):
        key = (b_pad, bb, n_nodes, mode)
        if key in self._call_cache:
            return self._call_cache[key]
        H, M, T = self.hidden, self.msg, self.target
        ea = self.e_size + 1
        N = n_nodes
        wmap = lambda s: (0, 0)
        in_specs = [
            pl.BlockSpec((bb, N, H), lambda s: (s, 0, 0)),             # h0 (padded)
            pl.BlockSpec((bb, ea * N, N), lambda s: (s, 0, 0)),        # am (aug, k-major rows)
            pl.BlockSpec((bb, N, 1), lambda s: (s, 0, 0)),             # node mask
            pl.BlockSpec((ea * H, M), wmap),                           # We_aug (edge W + edge b)
            pl.BlockSpec((M + H, 4 * H), wmap),                        # fused GRU W
            pl.BlockSpec((1, 4 * H), wmap),                            # fused GRU b
            pl.BlockSpec((2 * H, 2 * T), wmap),                        # fused readout W
            pl.BlockSpec((1, 2 * T), wmap),                            # fused readout b
        ]
        if mode == 'embedding':
            out_specs = pl.BlockSpec((bb, 1, T), lambda s: (s, 0, 0))
            out_shape = jax.ShapeDtypeStruct((b_pad, 1, T), jnp.float32)
        else:
            out_specs = pl.BlockSpec((bb, N, H), lambda s: (s, 0, 0))
            out_shape = jax.ShapeDtypeStruct((b_pad, N, H), jnp.float32)
        kern = functools.partial(
            _mpnn_fused_kernel,
            n_layers=self.n_layers, n_nodes=N, e_aug=ea, hidden=H,
            target=T, mode=mode,
            log_softmax=(self.out_type == 'classification'))
        call = pl.pallas_call(
            kern,
            out_shape=out_shape,
            grid=(b_pad // bb,),
            in_specs=in_specs,
            out_specs=out_specs,
            compiler_params=pltpu.CompilerParams(
                dimension_semantics=("parallel",)),
        )
        self._call_cache[key] = call
        return call

    # ---- forward -------------------------------------------------------------
    def __call__(self, h_in, am, g_size, output='embedding'):
        B, N, F = h_in.shape
        H, E = self.hidden, self.e_size
        assert F <= H, "in_size must not exceed hidden_state_size"
        # Pad node features with zeros up to the hidden size (layer-0 state).
        if H > F:
            h0 = jnp.concatenate(
                [h_in, jnp.zeros((B, N, H - F), h_in.dtype)], axis=2)
        else:
            h0 = h_in
        h0 = h0.astype(jnp.float32)

        # node_mask as in the reference (computed here instead of in-kernel so the
        # kernel block layout is legal for any graphs-per-step count).
        g_size = jnp.asarray(g_size, jnp.int32)
        mask = (jnp.arange(N, dtype=jnp.int32)[None, :]
                < g_size[:, None]).astype(jnp.float32)[:, :, None]     # (B, N, 1)

        # am[b, v, w, k] -> rows k*N + v, plus one all-ones pseudo label block that
        # folds the EdgeNetwork bias-message into the same per-graph contraction.
        am_perm = jnp.transpose(am, (0, 3, 1, 2))                       # (B, E, N, N)
        am_aug = jnp.concatenate(
            [am_perm, jnp.ones((B, 1, N, N), am.dtype)], axis=1)
        am_aug = am_aug.reshape(B, (E + 1) * N, N).astype(self.mm_dtype)

        # Batch several graphs per grid step so the dense matmuls fill the MXU.
        bb = max(1, min(B, 128 // max(N, 1)))
        b_pad = -(-B // bb) * bb
        if b_pad > B:
            pad = b_pad - B
            h0 = jnp.concatenate([h0, jnp.zeros((pad, N, H), jnp.float32)], axis=0)
            am_aug = jnp.concatenate(
                [am_aug, jnp.zeros((pad, (E + 1) * N, N), self.mm_dtype)], axis=0)
            mask = jnp.concatenate([mask, jnp.zeros((pad, N, 1), jnp.float32)], axis=0)

        mode = 'embedding' if output == 'embedding' else 'hidden'
        call = self._build_call(b_pad, bb, N, mode)
        out = call(h0, am_aug, mask, self.we_aug, self.wg, self.b_gru,
                   self.w_read, self.b_read)
        if mode == 'embedding':
            return out[:B, 0, :]                                        # (B, T)
        return out[:B]                                                  # (B, N, H)


def _reference_forward(model, h_in, am, g_size, output='embedding'):
    """Pure-JAX f32 replica of the PyTorch forward (for a numerics sanity check)."""
    p = model._raw
    H, M, E = model.hidden, model.msg, model.e_size
    B, N, F = h_in.shape
    h_in = h_in.astype(jnp.float32)
    h_t = (jnp.concatenate([h_in, jnp.zeros((B, N, H - F), jnp.float32)], axis=2)
           if H > F else h_in)
    mask = (jnp.arange(N)[None, :] < g_size[:, None]).astype(jnp.float32)[..., None]
    We = p['w_edge'].reshape(M, H, E)
    be = p['b_edge'].reshape(M, H)
    for _ in range(model.n_layers):
        A = jnp.einsum('bvwk,mhk->bvwmh', am, We) + be[None, None, None]
        msg = jnp.einsum('bvwmh,bwh->bvm', A, h_t)
        gi = jnp.einsum('bvm,gm->bvg', msg, p['w_ih']) + p['b_ih']
        gh = jnp.einsum('bvh,gh->bvg', h_t, p['w_hh']) + p['b_hh']
        r = jax.nn.sigmoid(gi[..., :H] + gh[..., :H])
        z = jax.nn.sigmoid(gi[..., H:2 * H] + gh[..., H:2 * H])
        n = jnp.tanh(gi[..., 2 * H:] + r * gh[..., 2 * H:])
        h_t = mask * ((1.0 - z) * n + z * h_t)
    if output != 'embedding':
        return h_t
    cat = jnp.concatenate([h_t, h_in], axis=-1)
    gate = jax.nn.sigmoid(jnp.einsum('bvc,tc->bvt', cat, p['w_i']) + p['b_i'])
    val = jnp.einsum('bvh,th->bvt', h_t, p['w_j']) + p['b_j']
    res = jnp.sum(mask * gate * val, axis=1)
    if model.out_type == 'classification':
        res = jax.nn.log_softmax(res, axis=-1)
    return res


if __name__ == "__main__":
    key = jax.random.PRNGKey(0)
    B, N = 2, 8
    in_size, e_size = 4, 3
    hidden, message = 32, 32
    n_layers, target = 3, 5

    k_params, k_h, k_e = jax.random.split(key, 3)
    model = MpnnGGNN(in_size, e_size, hidden, message, n_layers, target,
                     key=k_params, out_type='classification')

    g_size = jnp.array([6, 8], dtype=jnp.int32)
    valid = (jnp.arange(N)[None, :] < g_size[:, None]).astype(jnp.float32)   # (B, N)

    h_in = jax.random.normal(k_h, (B, N, in_size), jnp.float32) * valid[..., None]
    am = jax.random.uniform(k_e, (B, N, N, e_size), jnp.float32)
    edge_mask = valid[:, :, None] * valid[:, None, :]                        # (B, N, N)
    am = am * edge_mask[..., None]                                           # (B, N, N, E)

    out_emb = jax.block_until_ready(model(h_in, am, g_size, output='embedding'))
    out_hid = jax.block_until_ready(model(h_in, am, g_size, output='hidden'))

    assert out_emb.shape == (B, target)
    assert out_hid.shape == (B, N, hidden)
    assert bool(jnp.all(jnp.isfinite(out_emb)))
    assert bool(jnp.all(jnp.isfinite(out_hid)))

    # numerics sanity check vs. a pure-JAX f32 reference (bf16 MXU tolerance)
    ref_emb = _reference_forward(model, h_in, am, g_size, output='embedding')
    ref_hid = _reference_forward(model, h_in, am, g_size, output='hidden')
    assert float(jnp.max(jnp.abs(out_hid - ref_hid))) < 5e-2
    assert float(jnp.max(jnp.abs(out_emb - ref_emb))) < 1e-1

    # regression-head instance (same weights) checks the raw readout more tightly
    model_reg = MpnnGGNN(in_size, e_size, hidden, message, n_layers, target,
                         key=k_params, out_type='regression')
    out_reg = jax.block_until_ready(model_reg(h_in, am, g_size, output='embedding'))
    ref_reg = _reference_forward(model_reg, h_in, am, g_size, output='embedding')
    assert float(jnp.max(jnp.abs(out_reg - ref_reg))) < 2.5e-2

    print("KERNEL_OK")
</pallas_src>

<mosaic_0001>
module attributes {stable_mosaic.version = 11 : i64} {
  func.func @_mpnn_fused_kernel(%arg0: i32, %arg1: memref<2x8x32xf32, #tpu.memory_space<vmem>>, %arg2: memref<2x32x8xbf16, #tpu.memory_space<vmem>>, %arg3: memref<2x8x1xf32, #tpu.memory_space<vmem>>, %arg4: memref<128x32xbf16, #tpu.memory_space<vmem>>, %arg5: memref<64x128xbf16, #tpu.memory_space<vmem>>, %arg6: memref<1x128xf32, #tpu.memory_space<vmem>>, %arg7: memref<64x10xbf16, #tpu.memory_space<vmem>>, %arg8: memref<1x10xf32, #tpu.memory_space<vmem>>, %arg9: memref<2x1x5xf32, #tpu.memory_space<vmem>>) attributes {dimension_semantics = [#tpu.dimension_semantics<parallel>], iteration_bounds = array<i64: 1>, scalar_prefetch = 0 : i64, scratch_operands = 0 : i64, tpu.core_type = #tpu.core_type<tc>, window_params = [{transform_indices = @transform_0, window_bounds = array<i64: 2, 8, 32>}, {transform_indices = @transform_1, window_bounds = array<i64: 2, 32, 8>}, {transform_indices = @transform_2, window_bounds = array<i64: 2, 8, 1>}, {pipeline_mode = #tpu.pipeline_mode<synchronous>, transform_indices = @transform_3, window_bounds = array<i64: 128, 32>}, {pipeline_mode = #tpu.pipeline_mode<synchronous>, transform_indices = @transform_4, window_bounds = array<i64: 64, 128>}, {pipeline_mode = #tpu.pipeline_mode<synchronous>, transform_indices = @transform_5, window_bounds = array<i64: 1, 128>}, {pipeline_mode = #tpu.pipeline_mode<synchronous>, transform_indices = @transform_6, window_bounds = array<i64: 64, 10>}, {pipeline_mode = #tpu.pipeline_mode<synchronous>, transform_indices = @transform_7, window_bounds = array<i64: 1, 10>}, {transform_indices = @transform_8, window_bounds = array<i64: 2, 1, 5>}]} {
    %c0 = arith.constant 0 : index
    %c0_0 = arith.constant 0 : index
    %c0_1 = arith.constant 0 : index
    %0 = vector.load %arg1[%c0, %c0_0, %c0_1] : memref<2x8x32xf32, #tpu.memory_space<vmem>>, vector<2x8x32xf32>
    %1 = vector.shape_cast %0 : vector<2x8x32xf32> to vector<16x32xf32>
    %c0_2 = arith.constant 0 : index
    %c0_3 = arith.constant 0 : index
    %c0_4 = arith.constant 0 : index
    %2 = vector.load %arg3[%c0_2, %c0_3, %c0_4] : memref<2x8x1xf32, #tpu.memory_space<vmem>>, vector<2x8x1xf32>
    %3 = vector.shape_cast %2 : vector<2x8x1xf32> to vector<16x1xf32>
    %c0_5 = arith.constant 0 : index
    %c0_6 = arith.constant 0 : index
    %c0_7 = arith.constant 0 : index
    %4 = vector.load %arg2[%c0_5, %c0_6, %c0_7] : memref<2x32x8xbf16, #tpu.memory_space<vmem>>, vector<2x32x8xbf16>
    %c0_8 = arith.constant 0 : index
    %c0_9 = arith.constant 0 : index
    %5 = vector.load %arg4[%c0_8, %c0_9] : memref<128x32xbf16, #tpu.memory_space<vmem>>, vector<128x32xbf16>
    %c0_10 = arith.constant 0 : index
    %c0_11 = arith.constant 0 : index
    %6 = vector.load %arg5[%c0_10, %c0_11] : memref<64x128xbf16, #tpu.memory_space<vmem>>, vector<64x128xbf16>
    %c0_12 = arith.constant 0 : index
    %c0_13 = arith.constant 0 : index
    %7 = vector.load %arg6[%c0_12, %c0_13] : memref<1x128xf32, #tpu.memory_space<vmem>>, vector<1x128xf32>
    %c0_i32 = arith.constant 0 : i32
    %c3_i32 = arith.constant 3 : i32
    %8 = arith.addi %c0_i32, %c3_i32 : i32
    %c1_i32 = arith.constant 1 : i32
    %9 = scf.for %arg10 = %c0_i32 to %8 step %c1_i32 iter_args(%arg11 = %1) -> (vector<16x32xf32>)  : i32 {
      %42 = vector.shape_cast %arg11 : vector<16x32xf32> to vector<2x8x32xf32>
      %43 = arith.truncf %42 : vector<2x8x32xf32> to vector<2x8x32xbf16>
      "tpu.trace_start"() <{level = 10 : i32, message = "bpw,bwh->bph"}> : () -> ()
      %cst_25 = arith.constant dense<0.000000e+00> : vector<2x32x32xf32>
      %44 = tpu.matmul %4, %43, %cst_25 {dimension_numbers = #tpu.dot_dimension_numbers<[2], [1], [1], [2], [0, 0, 0, 1, 1, 2], [0], [0]>} : vector<2x32x8xbf16>, vector<2x8x32xbf16>, vector<2x32x32xf32> -> vector<2x32x32xf32>
      "tpu.trace_stop"() : () -> ()
      %45 = vector.extract_strided_slice %44 {offsets = [0, 0, 0], sizes = [2, 8, 32], strides = [1, 1, 1]} : vector<2x32x32xf32> to vector<2x8x32xf32>
      %46 = vector.extract_strided_slice %44 {offsets = [0, 8, 0], sizes = [2, 8, 32], strides = [1, 1, 1]} : vector<2x32x32xf32> to vector<2x8x32xf32>
      %47 = vector.extract_strided_slice %44 {offsets = [0, 16, 0], sizes = [2, 8, 32], strides = [1, 1, 1]} : vector<2x32x32xf32> to vector<2x8x32xf32>
      %48 = vector.extract_strided_slice %44 {offsets = [0, 24, 0], sizes = [2, 8, 32], strides = [1, 1, 1]} : vector<2x32x32xf32> to vector<2x8x32xf32>
      %49 = tpu.concatenate %45, %46, %47, %48 in 2 : vector<2x8x32xf32>, vector<2x8x32xf32>, vector<2x8x32xf32>, vector<2x8x32xf32> -> vector<2x8x128xf32>
      %50 = vector.shape_cast %49 : vector<2x8x128xf32> to vector<16x128xf32>
      %51 = arith.truncf %50 : vector<16x128xf32> to vector<16x128xbf16>
      %cst_26 = arith.constant dense<0.000000e+00> : vector<16x32xf32>
      %52 = tpu.matmul %51, %5, %cst_26 {dimension_numbers = #tpu.dot_dimension_numbers<[1], [0], [0], [1], [0, 0, 1, 1], [], []>} : vector<16x128xbf16>, vector<128x32xbf16>, vector<16x32xf32> -> vector<16x32xf32>
      %53 = tpu.concatenate %52, %arg11 in 1 : vector<16x32xf32>, vector<16x32xf32> -> vector<16x64xf32>
      %54 = arith.truncf %53 : vector<16x64xf32> to vector<16x64xbf16>
      %cst_27 = arith.constant dense<0.000000e+00> : vector<16x128xf32>
      %55 = tpu.matmul %54, %6, %cst_27 {dimension_numbers = #tpu.dot_dimension_numbers<[1], [0], [0], [1], [0, 0, 1, 1], [], []>} : vector<16x64xbf16>, vector<64x128xbf16>, vector<16x128xf32> -> vector<16x128xf32>
      %56 = vector.broadcast %7 : vector<1x128xf32> to vector<16x128xf32>
      %57 = arith.addf %55, %56 : vector<16x128xf32>
      %58 = vector.extract_strided_slice %57 {offsets = [0, 0], sizes = [16, 64], strides = [1, 1]} : vector<16x128xf32> to vector<16x64xf32>
      %59 = arith.negf %58 : vector<16x64xf32>
      %60 = math.exp %59 : vector<16x64xf32>
      %cst_28 = arith.constant 1.000000e+00 : f32
      %61 = vector.broadcast %cst_28 : f32 to vector<16x64xf32>
      %62 = arith.addf %61, %60 : vector<16x64xf32>
      %63 = arith.divf %61, %62 : vector<16x64xf32>
      %64 = vector.extract_strided_slice %63 {offsets = [0, 0], sizes = [16, 32], strides = [1, 1]} : vector<16x64xf32> to vector<16x32xf32>
      %65 = vector.extract_strided_slice %63 {offsets = [0, 32], sizes = [16, 32], strides = [1, 1]} : vector<16x64xf32> to vector<16x32xf32>
      %66 = vector.extract_strided_slice %57 {offsets = [0, 64], sizes = [16, 32], strides = [1, 1]} : vector<16x128xf32> to vector<16x32xf32>
      %67 = vector.extract_strided_slice %57 {offsets = [0, 96], sizes = [16, 32], strides = [1, 1]} : vector<16x128xf32> to vector<16x32xf32>
      %68 = arith.mulf %64, %67 : vector<16x32xf32>
      %69 = arith.addf %66, %68 : vector<16x32xf32>
      %70 = math.tanh %69 : vector<16x32xf32>
      %cst_29 = arith.constant 1.000000e+00 : f32
      %71 = vector.broadcast %cst_29 : f32 to vector<16x32xf32>
      %72 = arith.subf %71, %65 : vector<16x32xf32>
      %73 = arith.mulf %72, %70 : vector<16x32xf32>
      %74 = arith.mulf %65, %arg11 : vector<16x32xf32>
      %75 = arith.addf %73, %74 : vector<16x32xf32>
      %76 = vector.broadcast %3 : vector<16x1xf32> to vector<16x32xf32>
      %77 = arith.mulf %76, %75 : vector<16x32xf32>
      scf.yield %77 : vector<16x32xf32>
    }
    %10 = tpu.concatenate %9, %1 in 1 : vector<16x32xf32>, vector<16x32xf32> -> vector<16x64xf32>
    %11 = arith.truncf %10 : vector<16x64xf32> to vector<16x64xbf16>
    %c0_14 = arith.constant 0 : index
    %c0_15 = arith.constant 0 : index
    %12 = vector.load %arg7[%c0_14, %c0_15] : memref<64x10xbf16, #tpu.memory_space<vmem>>, vector<64x10xbf16>
    %cst = arith.constant dense<0.000000e+00> : vector<16x10xf32>
    %13 = tpu.matmul %11, %12, %cst {dimension_numbers = #tpu.dot_dimension_numbers<[1], [0], [0], [1], [0, 0, 1, 1], [], []>} : vector<16x64xbf16>, vector<64x10xbf16>, vector<16x10xf32> -> vector<16x10xf32>
    %c0_16 = arith.constant 0 : index
    %c0_17 = arith.constant 0 : index
    %14 = vector.load %arg8[%c0_16, %c0_17] : memref<1x10xf32, #tpu.memory_space<vmem>>, vector<1x10xf32>
    %15 = vector.broadcast %14 : vector<1x10xf32> to vector<16x10xf32>
    %16 = arith.addf %13, %15 : vector<16x10xf32>
    %17 = vector.extract_strided_slice %16 {offsets = [0, 0], sizes = [16, 5], strides = [1, 1]} : vector<16x10xf32> to vector<16x5xf32>
    %18 = arith.negf %17 : vector<16x5xf32>
    %19 = math.exp %18 : vector<16x5xf32>
    %cst_18 = arith.constant 1.000000e+00 : f32
    %20 = vector.broadcast %cst_18 : f32 to vector<16x5xf32>
    %21 = arith.addf %20, %19 : vector<16x5xf32>
    %22 = arith.divf %20, %21 : vector<16x5xf32>
    %23 = vector.extract_strided_slice %16 {offsets = [0, 5], sizes = [16, 5], strides = [1, 1]} : vector<16x10xf32> to vector<16x5xf32>
    %24 = arith.mulf %22, %23 : vector<16x5xf32>
    %25 = vector.broadcast %3 : vector<16x1xf32> to vector<16x5xf32>
    %26 = arith.mulf %24, %25 : vector<16x5xf32>
    %27 = vector.shape_cast %26 : vector<16x5xf32> to vector<2x8x5xf32>
    %cst_19 = arith.constant dense<0.000000e+00> : vector<2x5xf32>
    %28 = vector.multi_reduction <add>, %27, %cst_19 [1] : vector<2x8x5xf32> to vector<2x5xf32>
    %29 = vector.shape_cast %28 : vector<2x5xf32> to vector<2x1x5xf32>
    %cst_20 = arith.constant dense<0xFF800000> : vector<2x1xf32>
    %30 = vector.multi_reduction <maximumf>, %29, %cst_20 [2] : vector<2x1x5xf32> to vector<2x1xf32>
    %31 = vector.shape_cast %30 : vector<2x1xf32> to vector<2x1x1xf32>
    %32 = vector.broadcast %31 : vector<2x1x1xf32> to vector<2x1x5xf32>
    %33 = arith.subf %29, %32 : vector<2x1x5xf32>
    %34 = math.exp %33 : vector<2x1x5xf32>
    %cst_21 = arith.constant dense<0.000000e+00> : vector<2x1xf32>
    %35 = vector.multi_reduction <add>, %34, %cst_21 [2] : vector<2x1x5xf32> to vector<2x1xf32>
    %36 = vector.shape_cast %35 : vector<2x1xf32> to vector<2x1x1xf32>
    %37 = math.log %36 : vector<2x1x1xf32>
    %38 = arith.addf %31, %37 : vector<2x1x1xf32>
    %39 = vector.broadcast %38 : vector<2x1x1xf32> to vector<2x1x5xf32>
    %40 = arith.subf %29, %39 : vector<2x1x5xf32>
    %c0_22 = arith.constant 0 : index
    %c0_23 = arith.constant 0 : index
    %c0_24 = arith.constant 0 : index
    %41 = vector.load %arg9[%c0_22, %c0_23, %c0_24] : memref<2x1x5xf32, #tpu.memory_space<vmem>>, vector<2x1x5xf32>
    tpu.vector_store %arg9[%c0_22, %c0_23, %c0_24], %40 {strides = array<i32>} : memref<2x1x5xf32, #tpu.memory_space<vmem>>, vector<2x1x5xf32>,
    return
  }
  func.func @transform_0(%arg0: i32) -> (i32, i32, i32) {
    %c0_i32 = arith.constant 0 : i32
    %c0_i32_0 = arith.constant 0 : i32
    %c0_i32_1 = arith.constant 0 : i32
    return %arg0, %c0_i32, %c0_i32_0 : i32, i32, i32
  }
  func.func @transform_1(%arg0: i32) -> (i32, i32, i32) {
    %c0_i32 = arith.constant 0 : i32
    %c0_i32_0 = arith.constant 0 : i32
    %c0_i32_1 = arith.constant 0 : i32
    return %arg0, %c0_i32, %c0_i32_0 : i32, i32, i32
  }
  func.func @transform_2(%arg0: i32) -> (i32, i32, i32) {
    %c0_i32 = arith.constant 0 : i32
    %c0_i32_0 = arith.constant 0 : i32
    %c0_i32_1 = arith.constant 0 : i32
    return %arg0, %c0_i32, %c0_i32_0 : i32, i32, i32
  }
  func.func @transform_3(%arg0: i32) -> (i32, i32) {
    %c0_i32 = arith.constant 0 : i32
    %c0_i32_0 = arith.constant 0 : i32
    %c0_i32_1 = arith.constant 0 : i32
    return %c0_i32, %c0_i32_0 : i32, i32
  }
  func.func @transform_4(%arg0: i32) -> (i32, i32) {
    %c0_i32 = arith.constant 0 : i32
    %c0_i32_0 = arith.constant 0 : i32
    %c0_i32_1 = arith.constant 0 : i32
    return %c0_i32, %c0_i32_0 : i32, i32
  }
  func.func @transform_5(%arg0: i32) -> (i32, i32) {
    %c0_i32 = arith.constant 0 : i32
    %c0_i32_0 = arith.constant 0 : i32
    %c0_i32_1 = arith.constant 0 : i32
    return %c0_i32, %c0_i32_0 : i32, i32
  }
  func.func @transform_6(%arg0: i32) -> (i32, i32) {
    %c0_i32 = arith.constant 0 : i32
    %c0_i32_0 = arith.constant 0 : i32
    %c0_i32_1 = arith.constant 0 : i32
    return %c0_i32, %c0_i32_0 : i32, i32
  }
  func.func @transform_7(%arg0: i32) -> (i32, i32) {
    %c0_i32 = arith.constant 0 : i32
    %c0_i32_0 = arith.constant 0 : i32
    %c0_i32_1 = arith.constant 0 : i32
    return %c0_i32, %c0_i32_0 : i32, i32
  }
  func.func @transform_8(%arg0: i32) -> (i32, i32, i32) {
    %c0_i32 = arith.constant 0 : i32
    %c0_i32_0 = arith.constant 0 : i32
    %c0_i32_1 = arith.constant 0 : i32
    return %arg0, %c0_i32, %c0_i32_0 : i32, i32, i32
  }
}

</mosaic_0001>

<bundles_post_ra>
// kernel: tpu_custom_call.1
= control target key start
LH: loop header
LB: loop body
LE: loop exit
PB: predicated region body
PF: predicated region fallthrough
CT: control target
= control target key end

     0   :  { %13 = vsyncpa [#allocation3], 0  ;;  %s1200_s26 = smov 0   ;;  %s1329_s0 = inlined_call_operand.vmem [shape: f32[2,8,32], index: 0, kind: input, shape index: {}]   ;;  %s1330_s1 = inlined_call_operand.vmem [shape: bf16[2,32,8], index: 1, kind: input, shape index: {}]   ;;  %s1331_s2 = inlined_call_operand.vmem [shape: f32[2,8,1], index: 2, kind: input, shape index: {}]   ;;  %s1332_s3 = inlined_call_operand.vmem [shape: bf16[128,32], index: 3, kind: input, shape index: {}]   ;;  %s1333_s4 = inlined_call_operand.vmem [shape: bf16[64,128], index: 4, kind: input, shape index: {}]   ;;  %s1334_s5 = inlined_call_operand.vmem [shape: f32[1,128], index: 5, kind: input, shape index: {}]   ;;  %s1335_s6 = inlined_call_operand.vmem [shape: bf16[64,10], index: 6, kind: input, shape index: {}]   ;;  %s1336_s7 = inlined_call_operand.vmem [shape: f32[1,10], index: 7, kind: input, shape index: {}]   ;;  %s1337_s8 = inlined_call_operand.hbm [shape: f32[2,1,5], index: 8, kind: output, shape index: {}]  }
   0x1   :  { %v1012_v0 = vld [vmem:[%s1329_s0] sm:$0xff]   ;;  %v1017_v1 = vld [vmem:[%s1329_s0 + $0x8] sm:$0xff]   ;;  %v1052_v8 = vld [vmem:[%s1330_s1 + $0x10] sm:$0xf] }
   0x2   :  { %v1022_v2 = vld [vmem:[%s1331_s2] sm:$0xff]  ;;  %v1027_v3 = vld [vmem:[%s1331_s2 + $0x8] sm:$0xff]  ;;  %v1057_v9 = vld [vmem:[%s1330_s1 + $0x14] sm:$0xf]  ;;  %v1338_v37 = vmov %v1017_v1  ;;  %v1339_v38 = vmov %v1012_v0 }
   0x3   :  { %v1032_v4 = vld [vmem:[%s1330_s1] sm:$0xf]  ;;  %v1037_v5 = vld [vmem:[%s1330_s1 + $0x4] sm:$0xf]  ;;  %v1042_v6 = vld [vmem:[%s1330_s1 + $0x8] sm:$0xf] }
   0x4   :  { %v1047_v7 = vld [vmem:[%s1330_s1 + $0xc] sm:$0xf]  ;;  %v1062_v10 = vld [vmem:[%s1330_s1 + $0x18] sm:$0xf]  ;;  %v1067_v11 = vld [vmem:[%s1330_s1 + $0x1c] sm:$0xf] }
   0x5   :  { %v1072_v12 = vld [vmem:[%s1332_s3] sm:$0xf]  ;;  %v1077_v13 = vld [vmem:[%s1332_s3 + $0x4] sm:$0xf]  ;;  %v1082_v14 = vld [vmem:[%s1332_s3 + $0x8] sm:$0xf] }
   0x6   :  { %v1087_v15 = vld [vmem:[%s1332_s3 + $0xc] sm:$0xf]  ;;  %v1092_v16 = vld [vmem:[%s1332_s3 + $0x10] sm:$0xf]  ;;  %v1097_v17 = vld [vmem:[%s1332_s3 + $0x14] sm:$0xf] }
   0x7   :  { %v1102_v18 = vld [vmem:[%s1332_s3 + $0x18] sm:$0xf]  ;;  %v1107_v19 = vld [vmem:[%s1332_s3 + $0x1c] sm:$0xf]  ;;  %v1112_v20 = vld [vmem:[%s1332_s3 + $0x20] sm:$0xf] }
   0x8   :  { %v1117_v21 = vld [vmem:[%s1332_s3 + $0x24] sm:$0xf]  ;;  %v1122_v22 = vld [vmem:[%s1332_s3 + $0x28] sm:$0xf]  ;;  %v1127_v23 = vld [vmem:[%s1332_s3 + $0x2c] sm:$0xf] }
   0x9   :  { %v1132_v24 = vld [vmem:[%s1332_s3 + $0x30] sm:$0xf]  ;;  %v1137_v25 = vld [vmem:[%s1332_s3 + $0x34] sm:$0xf]  ;;  %v1142_v26 = vld [vmem:[%s1332_s3 + $0x38] sm:$0xf] }
   0xa   :  { %v1147_v27 = vld [vmem:[%s1332_s3 + $0x3c] sm:$0xf]  ;;  %v1152_v28 = vld [vmem:[%s1333_s4] sm:$0xf]  ;;  %v1157_v29 = vld [vmem:[%s1333_s4 + $0x4] sm:$0xf] }
   0xb   :  { %v1162_v30 = vld [vmem:[%s1333_s4 + $0x8] sm:$0xf]  ;;  %v1167_v31 = vld [vmem:[%s1333_s4 + $0xc] sm:$0xf]  ;;  %v1172_v32 = vld [vmem:[%s1333_s4 + $0x10] sm:$0xf] }
   0xc   :  { %v1177_v33 = vld [vmem:[%s1333_s4 + $0x14] sm:$0xf]  ;;  %v1182_v34 = vld [vmem:[%s1333_s4 + $0x18] sm:$0xf]  ;;  %v1187_v35 = vld [vmem:[%s1333_s4 + $0x1c] sm:$0xf] }
   0xd   :  { %v1192_v36 = vld [vmem:[%s1334_s5] ss:$0 sm:$0xff] }
   0xe LB: > { %v695_v39 = vcombine.low %v1032_v4, %v1037_v5  ;;  %vm88_vm0 = vcmask 64512   ;;  %vm95_vm1 = vcmask 1043456   ;;  %v76_v40 = vpack.c.bf16 %v944_v38, %v944_v38  ;;  %s952_s4 = smov 96   ;;  %s953_s5 = smov 32   ;;  %s948_s26 = sphi %s1200_s26, %s73_s26   ;;  %v944_v38 = vphi %v1339_v38, %v1341_v38   ;;  %v940_v37 = vphi %v1338_v37, %v1340_v37  }
   0xf   : > { %v77_v41 = vpack.c.bf16 %v940_v37, %v940_v37  ;;  %v696_v43 = vcombine.low %v1042_v6, %v1047_v7  ;;  %v699_v44 = vcombine.low %v1052_v8, %v1057_v9  ;;  %v700_v46 = vcombine.low %v1062_v10, %v1067_v11  ;;  %s954_s27 = smov 64   ;;  %s73_s26 = sadd.s32 1, %s948_s26  }
  0x10   : > { %754 = vmatprep.mubr.msk.bf16.mxu1 %vm88_vm0, %v695_v39  ;;  %808 = vmatprep.subr.msk.bf16.mxu1 %vm95_vm1, %v76_v40  ;;  %v97_v42 = vsel %vm95_vm1, %v76_v40, 0  ;;  %v710_v47 = vcombine.low %v1142_v26, %v1147_v27  ;;  %v950_v48 = vmov 0.0   ;;  %v709_v49 = vcombine.low %v1132_v24, %v1137_v25  ;;  %p70_p0 = scmp.ge.s32.totalorder %s73_s26, 3  }
  0x11   : > { %753 = vmatpush3.bf16.msra.mxu1 %v97_v42  ;;  %v165_v45 = vsel %vm95_vm1, %v77_v41, 0  ;;  %764 = vmatprep.subr.bf16.mxu0 %v950_v48  ;;  %v708_v50 = vcombine.low %v1122_v22, %v1127_v23  ;;  %v707_v51 = vcombine.low %v1112_v20, %v1117_v21  ;;  %v706_v52 = vcombine.low %v1102_v18, %v1107_v19  ;;  %s957_s30 = smov (%p70_p0), 32   ;;  %v719_v8 = vld [vmem:[%s1336_s7] ss:$0 sm:$0xff] (%p70_p0)  ;;  %s961_s7 = smov (%p70_p0), [#allocation2]  }
  0x12   : > { %809 = vmatprep.subr.msk.bf16.mxu1 %vm95_vm1, %v77_v41  ;;  %765 = vmatpush3.bf16.msra.mxu0 %v710_v47  ;;  %v705_v54 = vcombine.low %v1092_v16, %v1097_v17  ;;  %v704_v57 = vcombine.low %v1082_v14, %v1087_v15  ;;  %v703_v60 = vcombine.low %v1072_v12, %v1077_v13  ;;  %vm951_vm2 = vmmov 0   ;;  %s673_s16 = sshll.u32 (%p70_p0), %s961_s7, 4  ;;  %s674_s16 = int_to_ptr.vmem [resolvable:$true] %s673_s16 }
  0x13   : > { %766 = vmatprep.subr.bf16.mxu0 %v950_v48  ;;  %780 = vmatprep.mubr.msk.bf16.mxu0 %vm951_vm2, %v950_v48  ;;  %v715_v40 = vcombine.low %v1182_v34, %v1187_v35  ;;  %v714_v42 = vcombine.low %v1172_v32, %v1177_v33  ;;  %vm240_vm3 = vcmask 261120   ;;  %vm243_vm4 = vcmask 523264   ;;  %s904_s0 = scalar_lea.vmem (%p70_p0), %s674_s16, 32  ;;  %p909_p2 = scmp.lt.s32.totalorder (%p70_p0), %s674_s16, %s674_s16 }
  0x14   : > { %755 = vmatmul.mubr.msk.bf16.vlgmr.msra.gmra.mxu1 %vm88_vm0, %v696_v43  ;;  %vm246_vm5 = vcmask 785408   ;;  %vm958_vm6 = vmmov (%p70_p0), 0   ;;  %vm624_vm7 = vcmask (%p70_p0), 39936   ;;  %vm665_vm8 = vcmask (%p70_p0), 32768   ;;  %p905_p1 = scmp.ne.s32.totalorder (%p70_p0), %s674_s16, %s904_s0  ;;  %p910_p3 = scmp.lt.s32.totalorder (%p70_p0), %s904_s0, %s904_s0 }
  0x15   : > { %759 = vmatpush3.bf16.msra.mxu1 %v165_v45  ;;  %760 = vmatprep.mubr.msk.bf16.mxu1 %vm88_vm0, %v699_v44 }
  0x16   : > { %784 = vmatprep.subr.bf16.mxu1 %v950_v48  ;;  %767 = vmatpush3.bf16.msra.mxu0 %v709_v49  ;;  %p911_p4 = por (%p70_p0), %p910_p3, %p909_p2 }
  0x17   : > { %768 = vmatprep.subr.bf16.mxu0 %v950_v48 }
  0x18   :  { %p912_p5 = pnand (%p70_p0), %p911_p4, %p905_p1 }
  0x1a   : > { %769 = vmatpush3.bf16.msra.mxu0 %v708_v50 }
  0x1b   : > { %770 = vmatprep.subr.bf16.mxu0 %v950_v48 }
  0x1c   : > { %761 = vmatmul.mubr.msk.bf16.vlgmr.msra.gmra.mxu1 %vm88_vm0, %v700_v46 }
  0x1d   : > { %792 = vmatprep.mubr.msk.bf16.mxu1 %vm951_vm2, %v950_v48  ;;  %785 = vmatpush3.bf16.msra.mxu1 %v715_v40 }
  0x1e   : > { %771 = vmatpush3.bf16.msra.mxu0 %v707_v51  ;;  %786 = vmatprep.subr.bf16.mxu1 %v950_v48 }
  0x1f   : > { %772 = vmatprep.subr.bf16.mxu0 %v950_v48 }
  0x21   : > { %787 = vmatpush3.bf16.msra.mxu1 %v714_v42 }
  0x22   : > { %773 = vmatpush3.bf16.msra.mxu0 %v706_v52  ;;  %788 = vmatprep.subr.bf16.mxu1 %v950_v48 }
  0x23   : > { %774 = vmatprep.subr.bf16.mxu0 %v950_v48 }
  0x26   : > { %775 = vmatpush3.bf16.msra.mxu0 %v705_v54 }
  0x27   : > { %776 = vmatprep.subr.bf16.mxu0 %v950_v48 }
  0x2a   : > { %777 = vmatpush3.bf16.msra.mxu0 %v704_v57 }
  0x2b   : > { %778 = vmatprep.subr.bf16.mxu0 %v950_v48 }
  0x2e   : > { %779 = vmatpush3.bf16.msra.mxu0 %v703_v60  ;;  %v713_v60 = vcombine.low %v1162_v30, %v1167_v31 }
  0x30   : > { %789 = vmatpush3.bf16.msra.mxu1 %v713_v60 }
  0x31   : > { %790 = vmatprep.subr.bf16.mxu1 %v950_v48 }
  0xd4   : > { %v756_v53 = vpop.f32.mrf.mxu1 }
  0xd6   : > { %v133_v55 = vpop.f32.mrf.mxu1 }
  0xd8   : > { %v757_v56 = vpop.f32.mrf.mxu1 }
  0xda   : > { %v136_v58 = vpop.f32.mrf.mxu1 }
  0xdc   : > { %v762_v59 = vpop.f32.mrf.mxu1 }
  0xdd   : > { %v853_v43 = vpack.i.bf16 %v762_v59, %v756_v53 }
  0xde   : > { %v201_v61 = vpop.f32.mrf.mxu1 }
  0xe0   : > { %v763_v62 = vpop.f32.mrf.mxu1 }
  0xe1   : > { %v858_v63 = vpack.i.bf16 %v763_v62, %v757_v56  ;;  %v712_v62 = vcombine.low %v1152_v28, %v1157_v29 }
  0xe2   : > { %v204_v39 = vpop.f32.mrf.mxu1 }
  0xe3   : > { %v848_v41 = vpack.i.bf16 %v204_v39, %v136_v58  ;;  %859 = vrot.lane.b32.xlu1 %v858_v63, %s952_s4  ;;  %791 = vmatpush3.bf16.msra.mxu1 %v712_v62 }
  0xe5   : > { %849 = vrot.lane.b32.xlu0 %v848_v41, %s953_s5 }
  0xe7   : > { %341 = vrot.lane.b32.xlu1 %v944_v38, %s953_s5 }
  0xe9   : > { %854 = vrot.lane.b32.xlu0 %v853_v43, %s954_s27 }
  0xed   : > { %343 = vrot.lane.b32.xlu0 %v940_v37, %s953_s5 }
 0x155   : > { %v860_v47 = vpop.permute.xlu1 %859 }
 0x156   : > { %v862_v38 = vunpack.i.h.bf16 %v860_v47  ;;  %v861_v52 = vunpack.i.l.bf16 %v860_v47 }
 0x157   : > { %v850_v44 = vpop.permute.xlu0 %849 }
 0x158   : > { %v852_v45 = vunpack.i.h.bf16 %v850_v44  ;;  %v851_v46 = vunpack.i.l.bf16 %v850_v44 }
 0x15a   : > { %v242_v53 = vsel %vm240_vm3, %v201_v61, %v852_v45  ;;  %v241_v54 = vsel %vm240_vm3, %v133_v55, %v851_v46  ;;  %v342_v55 = vpop.permute.xlu1 %341 }
 0x15b   : > { %v855_v49 = vpop.permute.xlu0 %854 }
 0x15c   : > { %v857_v50 = vunpack.i.h.bf16 %v855_v49  ;;  %v856_v51 = vunpack.i.l.bf16 %v855_v49 }
 0x15e   : > { %v244_v56 = vsel %vm243_vm4, %v241_v54, %v856_v51  ;;  %v245_v37 = vsel %vm243_vm4, %v242_v53, %v857_v50 }
 0x15f   : > { %v247_v57 = vsel %vm246_vm5, %v244_v56, %v861_v52  ;;  %v248_v58 = vsel %vm246_vm5, %v245_v37, %v862_v38  ;;  %v344_v39 = vpop.permute.xlu0 %343  ;;  %v955_v37 = vmov 0  }
 0x160   : > { %v249_v59 = vpack.c.bf16 %v248_v58, %v247_v57  ;;  %863 = vset.pattern.permute.xlu1 %v955_v37  ;;  %864 = vset.pattern.permute.xlu0 %v955_v37 }
 0x162   : > { %781 = vmatmul.mubr.bf16.vlgmr.msra.gmra.mxu0 %v249_v59 }
 0x222   : > { %v332_v61 = vpop.f32.mrf.mxu0 }
 0x223   : > { %v347_v41 = vsel %vm240_vm3, %v332_v61, %v342_v55 }
 0x224   : > { %v782_v63 = vpop.f32.mrf.mxu0 }
 0x226   : > { %v335_v40 = vpop.f32.mrf.mxu0 }
 0x227   : > { %v348_v42 = vsel %vm240_vm3, %v335_v40, %v344_v39 }
 0x228   : > { %v349_v43 = vpack.c.bf16 %v348_v42, %v347_v41  ;;  %v783_v44 = vpop.f32.mrf.mxu0 }
 0x22a   : > { %793 = vmatmul.mubr.msk.bf16.vlgmr.msra.gmra.mxu1 %vm243_vm4, %v349_v43 }
 0x2ea   : > { %v417_v45 = vpop.f32.mrf.mxu1 }
 0x2eb   : > { %v418_v48 = vadd.f32 %v1192_v36, %v417_v45 }
 0x2ec   : > { %v794_v46 = vpop.f32.mrf.mxu1 }
 0x2ed   : > { %438 = vrot.lane.b32.xlu1 %v418_v48, %s953_s5  ;;  %v717_v51 = vmul.f32 -1.442695, %v418_v48 }
 0x2ee   : > { %v420_v47 = vpop.f32.mrf.mxu1 }
 0x2ef   : > { %v421_v49 = vadd.f32 %v1192_v36, %v420_v47  ;;  %865 = vpow2.f32 %v717_v51 }
 0x2f0   : > { %v795_v50 = vpop.f32.mrf.mxu1 }
 0x2f1   : > { %440 = vrot.lane.b32.xlu0 %v421_v49, %s953_s5  ;;  %v718_v38 = vmul.f32 -1.442695, %v421_v49 }
 0x2f3   : > { %867 = vpow2.f32 %v718_v38 }
 0x2fc   : > { %v866_v52 = vpop.eup %865 }
 0x2fd   : > { %v430_v53 = vadd.f32 1.0, %v866_v52 }
 0x2ff   : > { %869 = vrcp.f32 %v430_v53 }
 0x300   : > { %v868_v54 = vpop.eup %867 }
 0x301   : > { %v431_v56 = vadd.f32 1.0, %v868_v54 }
 0x303   : > { %871 = vrcp.f32 %v431_v56 }
 0x30c   : > { %v870_v57 = vpop.eup %869 }
 0x30d   : > { %v458_v46 = vsub.f32 1.0, %v870_v57  ;;  %v470_v50 = vmul.f32 %v870_v57, %v342_v55  ;;  %v877_v55 = vpack.i.bf16 (%p70_p0), %v1017_v1, %v1012_v0  ;;  %v886_v0 = vld [vmem:[%s1335_s6 + $0x8] sm:$0xff] (%p70_p0)   ;;  %v887_v1 = vld [vmem:[%s1335_s6] sm:$0xff] (%p70_p0)  }
 0x310   : > { %v872_v60 = vpop.eup %871 }
 0x311   : > { %v459_v52 = vsub.f32 1.0, %v872_v60  ;;  %v471_v56 = vmul.f32 %v872_v60, %v344_v39  ;;  %v956_v39 = vmov (%p70_p0), 0.0  }
 0x312   :  { %796 = vmatprep.subr.bf16.mxu0 (%p70_p0), %v956_v39  ;;  %804 = vmatprep.mubr.msk.bf16.mxu0 (%p70_p0), %vm958_vm6, %v956_v39 }
 0x35f   : > { %v439_v58 = vpop.permute.xlu1 %438 }
 0x360   : > { %v444_v59 = vmul.f32 %v870_v57, %v439_v58  ;;  %v884_v57 = vld [vmem:[%s1335_s6 + $0x18] sm:$0xff] (%p70_p0)  }
 0x361   :  { %797 = vmatpush3.bf16.msra.mxu0 (%p70_p0), %v884_v57 }
 0x362   : > { %448 = vrot.lane.b32.xlu1 %v444_v59, %s954_s27  ;;  %798 = vmatprep.subr.bf16.mxu0 (%p70_p0), %v956_v39 }
 0x363   : > { %v441_v62 = vpop.permute.xlu0 %440 }
 0x364   : > { %v445_v61 = vmul.f32 %v872_v60, %v441_v62  ;;  %v885_v60 = vld [vmem:[%s1335_s6 + $0x10] sm:$0xff] (%p70_p0)   ;;  %s960_s6 = smov (%p70_p0), 123  }
 0x365   :  { %799 = vmatpush3.bf16.msra.mxu0 (%p70_p0), %v885_v60 }
 0x366   : > { %450 = vrot.lane.b32.xlu0 %v445_v61, %s954_s27  ;;  %476 = vperm.xlu1 %863, %v1022_v2   ;;  %v959_v61 = vmov (%p70_p0), 0  }
 0x367   :  { %800 = vmatprep.subr.bf16.mxu0 (%p70_p0), %v956_v39 }
 0x369   :  { %801 = vmatpush3.bf16.msra.mxu0 (%p70_p0), %v886_v0 }
 0x36a   : > { %481 = vperm.xlu0 %864, %v1027_v3   ;;  %883 = vset.pattern.permute.xlu1 (%p70_p0), %v959_v61 }
 0x36b   :  { %802 = vmatprep.subr.bf16.mxu0 (%p70_p0), %v956_v39 }
 0x36d   :  { %803 = vmatpush3.bf16.msra.mxu0 (%p70_p0), %v887_v1 }
 0x36e   :  { %882 = vset.pattern.permute.xlu0 (%p70_p0), %v959_v61 }
 0x3d4   : > { %v449_v63 = vpop.permute.xlu1 %448 }
 0x3d5   : > { %v454_v40 = vadd.f32 %v449_v63, %v418_v48 }
 0x3d7   : > { %873 = vtanh.f32 %v454_v40 }
 0x3d8   : > { %v451_v41 = vpop.permute.xlu0 %450 }
 0x3d9   : > { %v455_v42 = vadd.f32 %v451_v41, %v421_v49 }
 0x3db   : > { %875 = vtanh.f32 %v455_v42 }
 0x3e1   : > { %v477_v45 = vpop.permute.xlu1 %476 }
 0x3e4   : > { %v874_v43 = vpop.eup %873 }
 0x3e5   : > { %462 = vrot.lane.b32.xlu1 %v874_v43, %s952_s4  ;;  %v482_v37 = vpop.permute.xlu0 %481 }
 0x3e8   : > { %v876_v44 = vpop.eup %875 }
 0x3e9   : > { %464 = vrot.lane.b32.xlu1 %v876_v44, %s952_s4 }
 0x457   : > { %v463_v47 = vpop.permute.xlu1 %462 }
 0x458   : > { %v468_v51 = vmul.f32 %v463_v47, %v458_v46 }
 0x45a   : > { %v472_v38 = vadd.f32 %v470_v50, %v468_v51 }
 0x45b   : > { %v465_v53 = vpop.permute.xlu1 %464 }
 0x45c   : > { %v469_v54 = vmul.f32 %v465_v53, %v459_v52  ;;  %v484_v48 = vmul.f32 %v477_v45, %v472_v38 }
 0x45e   : > { %488 = vrot.lane.b32.xlu0 %v484_v48, %s952_s4  ;;  %v473_v49 = vadd.f32 %v471_v56, %v469_v54 }
 0x460   : > { %v485_v58 = vmul.f32 %v482_v37, %v473_v49 }
 0x462   : > { %490 = vrot.lane.b32.xlu1 %v485_v58, %s952_s4  ;;  %878 = vrot.lane.b32.xlu0 (%p70_p0), %v877_v55, %s957_s30 }
 0x466   :  { %619 = vperm.xlu1 (%p70_p0), %883, %v1027_v3   ;;  %614 = vperm.xlu0 (%p70_p0), %882, %v1022_v2  }
 0x4d0   : > { %v489_v59 = vpop.permute.xlu0 %488  }
 0x4d1   : > { %v1341_v38 = vmov %v489_v59  ;;  %72 = sbr.rel (!%p70_p0) target bundleno = 14 (0xe), region = 59 }
 0x4d4   : > { %v491_v62 = vpop.permute.xlu1 %490   ;;  %v879_v4 = vpop.permute.xlu0 (%p70_p0), %878 }
 0x4d5   : > { %v1340_v37 = vmov %v491_v62  ;;  %v881_v5 = vunpack.i.h.bf16 (%p70_p0), %v879_v4  ;;  %v880_v6 = vunpack.i.l.bf16 (%p70_p0), %v879_v4 }
 0x4d7   :  { %v504_v3 = vsel %vm240_vm3, %v491_v62, %v881_v5  ;;  %v503_v2 = vsel %vm240_vm3, %v489_v59, %v880_v6 }
 0x4d8   :  { %v505_v7 = vpack.c.bf16 %v504_v3, %v503_v2 }
 0x4da   :  { %805 = vmatmul.mubr.msk.bf16.vlgmr.msra.gmra.mxu0 %vm243_vm4, %v505_v7 }
 0x4e1   :  { %v620_v21 = vpop.permute.xlu1 %619  ;;  %v615_v24 = vpop.permute.xlu0 %614 }
 0x59a   :  { %v583_v9 = vpop.f32.mrf.mxu0 }
 0x59b   :  { %v584_v10 = vadd.f32 %v719_v8, %v583_v9 }
 0x59c   :  { %v806_v11 = vpop.f32.mrf.mxu0 }
 0x59d   :  { %604 = vrot.lane.b32.xlu1 %v584_v10, %s960_s6  ;;  %v725_v15 = vmul.f32 -1.442695, %v584_v10 }
 0x59e   :  { %v586_v12 = vpop.f32.mrf.mxu0 }
 0x59f   :  { %v587_v13 = vadd.f32 %v719_v8, %v586_v12  ;;  %888 = vpow2.f32 %v725_v15 }
 0x5a0   :  { %v807_v14 = vpop.f32.mrf.mxu0 }
 0x5a1   :  { %606 = vrot.lane.b32.xlu1 %v587_v13, %s960_s6  ;;  %v726_v16 = vmul.f32 -1.442695, %v587_v13 }
 0x5a3   :  { %890 = vpow2.f32 %v726_v16 }
 0x5ac   :  { %v889_v17 = vpop.eup %888 }
 0x5ad   :  { %v596_v18 = vadd.f32 1.0, %v889_v17 }
 0x5af   :  { %892 = vrcp.f32 %v596_v18 }
 0x5b0   :  { %v891_v19 = vpop.eup %890 }
 0x5b1   :  { %v597_v20 = vadd.f32 1.0, %v891_v19 }
 0x5b3   :  { %894 = vrcp.f32 %v597_v20 }
 0x5bc   :  { %v893_v22 = vpop.eup %892 }
 0x5c0   :  { %v895_v27 = vpop.eup %894 }
 0x60f   :  { %v605_v23 = vpop.permute.xlu1 %604 }
 0x610   :  { %v610_v25 = vmul.f32 %v893_v22, %v605_v23 }
 0x612   :  { %v622_v26 = vmul.f32 %v615_v24, %v610_v25 }
 0x613   :  { %v607_v28 = vpop.permute.xlu1 %606 }
 0x614   :  { %v625_v29 = vsel %vm624_vm7, %v622_v26, 0.0  ;;  %v611_v30 = vmul.f32 %v895_v27, %v607_v28 }
 0x615   :  { %v626_v31 = vrot.slane %v625_v29, 4 }
 0x616   :  { %v623_v32 = vmul.f32 %v620_v21, %v611_v30 }
 0x617   :  { %v627_v33 = vadd.f32 %v626_v31, %v625_v29 }
 0x618   :  { %v632_v34 = vsel %vm624_vm7, %v623_v32, 0.0 }
 0x619   :  { %v628_v35 = vrot.slane %v627_v33, 2  ;;  %v633_v36 = vrot.slane %v632_v34, 4 }
 0x61b   :  { %v629_v63 = vadd.f32 %v628_v35, %v627_v33  ;;  %v634_v40 = vadd.f32 %v633_v36, %v632_v34 }
 0x61d   :  { %v635_v41 = vrot.slane %v634_v40, 2  ;;  %v630_v42 = vrot.slane %v629_v63, 1 }
 0x61f   :  { %v631_v43 = vadd.f32 %v630_v42, %v629_v63  ;;  %v636_v44 = vadd.f32 %v635_v41, %v634_v40 }
 0x621   :  { %v639_v45 = vsel %vm624_vm7, %v631_v43, -inf  ;;  %v637_v46 = vrot.slane %v636_v44, 1 }
 0x622   :  { %640 = vmax.xlane.f32.xlu0 %v639_v45 }
 0x623   :  { %v638_v47 = vadd.f32 %v637_v46, %v636_v44 }
 0x625   :  { %v642_v50 = vsel %vm624_vm7, %v638_v47, -inf }
 0x626   :  { %643 = vmax.xlane.f32.xlu1 %v642_v50 }
 0x6ab   :  { %v641_v51 = vpop.xlane.xlu0 %640 }
 0x6ac   :  { %v645_v38 = vsub.f32 %v631_v43, %v641_v51 }
 0x6ae   :  { %v647_v52 = vmul.f32 1.442695, %v645_v38 }
 0x6af   :  { %v644_v53 = vpop.xlane.xlu1 %643 }
 0x6b0   :  { %896 = vpow2.f32 %v647_v52  ;;  %v646_v54 = vsub.f32 %v638_v47, %v644_v53 }
 0x6b2   :  { %v649_v48 = vmul.f32 1.442695, %v646_v54 }
 0x6b4   :  { %898 = vpow2.f32 %v649_v48 }
 0x6bd   :  { %v897_v56 = vpop.eup %896 }
 0x6be   :  { %v651_v37 = vsel %vm624_vm7, %v897_v56, 0.0 }
 0x6bf   :  { %652 = vadd.xlane.f32.xlu0 %v651_v37 }
 0x6c1   :  { %v899_v49 = vpop.eup %898 }
 0x6c2   :  { %v654_v58 = vsel %vm624_vm7, %v899_v49, 0.0 }
 0x6c3   :  { %655 = vadd.xlane.f32.xlu0 %v654_v58 }
 0x748   :  { %v653_v59 = vpop.xlane.xlu0 %652 }
 0x749   :  { %900 = vlog2.f32 %v653_v59 }
 0x74c   :  { %v656_v62 = vpop.xlane.xlu0 %655 }
 0x74d   :  { %902 = vlog2.f32 %v656_v62 }
 0x756   :  { %v901_v55 = vpop.eup %900 }
 0x757   :  { %v658_v39 = vmul.f32 0.6931472, %v901_v55 }
 0x759   :  { %v661_v57 = vadd.f32 %v658_v39, %v641_v51 }
 0x75a   :  { %v903_v60 = vpop.eup %902 }
 0x75b   :  { %v660_v61 = vmul.f32 0.6931472, %v903_v60  ;;  %v663_v0 = vsub.f32 %v631_v43, %v661_v57 }
 0x75d   :  { %v662_v1 = vadd.f32 %v660_v61, %v644_v53  ;;  %666 = vst.msk [vmem:[#allocation2] sm:$0x1] %vm665_vm8, %v663_v0 }
 0x75f   :  { %v664_v4 = vsub.f32 %v638_v47, %v662_v1 }
 0x761   :  { %667 = vst.msk [vmem:[#allocation2 + $0x1] sm:$0x1] %vm665_vm8, %v664_v4 }
 0x762   :  { %915 = shalt.err (!%p912_p5)
}
 0x763   :  { %s962_s17 = smov 16   ;;  %s963_s3 = smov 1  }
 0x764   :  { %679 = dma.vmem_to_hbm [thread:$0]  %s674_s16, 32, %s1337_s8, [#allocation3], %s962_s17, %s962_s17, %s963_s3  }
 0x765   :  { %936 = dma.done.wait [#allocation3], 32  }
 0x766   :  { %937 = vsyncadd [#allocation3], 4294967264 }
 0x767   :  { %683 = vsyncpa [#allocation3], 1 }

</bundles_post_ra>
